<compile_context>
chip_gen: v7x
topology: tpu7x:2x2x1
jax: 0.10.0
libtpu: 0.0.40
codegen_flags: <defaults>
</compile_context>

<pallas_src>
import functools
import math

import jax
import jax.numpy as jnp
from jax import lax
from jax.experimental import pallas as pl
from jax.experimental.pallas import tpu as pltpu

_LANE = 128


def _gcn_kernel(feat_ref, adj_ref, w_ref, logsm_ref, layers_ref, *, n_layer, out_dim):
    out_pad = w_ref.shape[1]

    a = adj_ref[...].astype(jnp.float32)

    # Degrees of (A + I): one lane reduction + 1 for the self loop.
    deg = jnp.sum(a, axis=1, keepdims=True) + 1.0       # (n, 1)
    scale = lax.rsqrt(deg)                              # D^-1/2
    inv_deg = scale * scale                             # 1/deg (no divide)

    # bf16 MXU operand; binary adjacency is represented exactly in bf16.
    a_bf16 = a.astype(jnp.bfloat16)

    # X = features @ lin  (lin zero-padded to lane-dense out_pad columns,
    # so padded X columns are exactly zero and stay zero under propagation).
    x = jnp.dot(feat_ref[...], w_ref[...], preferred_element_type=jnp.float32)

    # n_layer propagations:
    #   D^-1/2 (A+I) D^-1/2 X  ==  scale * (A @ (scale*X)) + (1/deg) * X
    for i in range(n_layer):
        xs = (scale * x).astype(jnp.bfloat16)
        x = scale * jnp.dot(a_bf16, xs, preferred_element_type=jnp.float32) \
            + inv_deg * x
        layers_ref[i] = x.astype(layers_ref.dtype)

    # Row-wise log_softmax over the valid (unpadded) columns only.
    col = lax.broadcasted_iota(jnp.int32, (1, out_pad), 1)
    valid = col < out_dim
    xm = jnp.where(valid, x, jnp.float32(-1e30))
    m = jnp.max(xm, axis=1, keepdims=True)
    s = xm - m
    p = jnp.where(valid, jnp.exp(s), 0.0)
    lse = jnp.log(jnp.sum(p, axis=1, keepdims=True))
    logsm_ref[...] = jnp.where(valid, s - lse, 0.0).astype(logsm_ref.dtype)


def simple_gcn_forward(features, adj, lin, n_layer):
    """Fused SimpleGCN forward. Returns (log_softmax(X), X, layers[n_layer,N,out])."""
    n, in_dim = features.shape
    out_dim = lin.shape[1]
    out_pad = ((out_dim + _LANE - 1) // _LANE) * _LANE

    lin_p = lin if out_pad == out_dim else jnp.pad(
        lin, ((0, 0), (0, out_pad - out_dim)))

    vmem = pl.BlockSpec(memory_space=pltpu.MemorySpace.VMEM)
    kernel = functools.partial(_gcn_kernel, n_layer=n_layer, out_dim=out_dim)

    # Rough VMEM high-water estimate (adj f32 + bf16 copy, operands, x temps,
    # outputs), doubled for compiler temporaries; clamped to stay inside every
    # chip's physical VMEM (v7x: 64 MiB).
    est = (
        n * n * 6
        + n * in_dim * 4 + in_dim * out_pad * 4
        + 4 * n * out_pad * 4
        + (n_layer + 1) * n * out_pad * 4
    )
    vmem_limit = min(max(2 * est, 32 * 1024 * 1024), 48 * 1024 * 1024)

    logsm, layers = pl.pallas_call(
        kernel,
        out_shape=(
            jax.ShapeDtypeStruct((n, out_pad), jnp.float32),
            jax.ShapeDtypeStruct((n_layer, n, out_pad), jnp.float32),
        ),
        in_specs=[vmem, vmem, vmem],
        out_specs=(vmem, vmem),
        compiler_params=pltpu.CompilerParams(vmem_limit_bytes=vmem_limit),
    )(features, adj, lin_p)

    logsm = logsm[:, :out_dim]
    layers = layers[:, :, :out_dim]
    x = layers[-1]  # X is identical to the last propagation layer.
    return logsm, x, layers


def _reference(features, adj, lin, n_layer):
    """Plain-JAX f32 reference (matches the torch module with dropout=0)."""
    n = adj.shape[0]
    a = adj + jnp.eye(n, dtype=jnp.float32)
    d = jnp.sum(a, axis=1)
    d_inv_sqrt = 1.0 / jnp.sqrt(d)
    a_norm = a * d_inv_sqrt[:, None] * d_inv_sqrt[None, :]
    x = features @ lin
    layers = []
    for _ in range(n_layer):
        x = a_norm @ x
        layers.append(x)
    logsm = jax.nn.log_softmax(x, axis=1)
    return logsm, x, jnp.stack(layers)


if __name__ == "__main__":
    N, IN_DIM, OUT_DIM, N_LAYER = 128, 32, 16, 3

    key = jax.random.PRNGKey(0)
    k_feat, k_adj, k_w = jax.random.split(key, 3)

    # Node features.
    features = jax.random.normal(k_feat, (N, IN_DIM), dtype=jnp.float32)

    # Symmetric binary adjacency (undirected graph).
    r = (jax.random.uniform(k_adj, (N, N)) < 0.05).astype(jnp.float32)
    adj = jnp.clip(r + r.T, 0.0, 1.0)

    # nn.Parameter(in_dim, out_dim) with kaiming_uniform_ (fan_in = out_dim).
    bound = math.sqrt(6.0 / OUT_DIM)
    lin = jax.random.uniform(
        k_w, (IN_DIM, OUT_DIM), dtype=jnp.float32, minval=-bound, maxval=bound
    )

    logsm, x_out, layers = simple_gcn_forward(features, adj, lin, N_LAYER)
    jax.block_until_ready((logsm, x_out, layers))

    # Validate against plain-JAX f32 reference.  Tolerance is relaxed vs. the
    # pure-f32 version because the propagation matmuls feed bf16 operands to
    # the MXU (f32 accumulation); observed error is ~1e-3.
    ref_logsm, ref_x, ref_layers = _reference(features, adj, lin, N_LAYER)
    assert jnp.allclose(logsm, ref_logsm, atol=2e-2, rtol=2e-2)
    assert jnp.allclose(x_out, ref_x, atol=2e-2, rtol=2e-2)
    assert jnp.allclose(layers, ref_layers, atol=2e-2, rtol=2e-2)

    print("KERNEL_OK")
</pallas_src>

<mosaic_0001>
module attributes {stable_mosaic.version = 11 : i64} {
  func.func @_gcn_kernel(%arg0: memref<128x32xf32, #tpu.memory_space<vmem>>, %arg1: memref<128x128xf32, #tpu.memory_space<vmem>>, %arg2: memref<32x128xf32, #tpu.memory_space<vmem>>, %arg3: memref<128x128xf32, #tpu.memory_space<vmem>>, %arg4: memref<3x128x128xf32, #tpu.memory_space<vmem>>) attributes {dimension_semantics = [], scalar_prefetch = 0 : i64, scratch_operands = 0 : i64, tpu.core_type = #tpu.core_type<tc>} {
    %c0 = arith.constant 0 : index
    %c0_0 = arith.constant 0 : index
    %0 = vector.load %arg1[%c0, %c0_0] : memref<128x128xf32, #tpu.memory_space<vmem>>, vector<128x128xf32>
    %cst = arith.constant dense<0.000000e+00> : vector<128xf32>
    %1 = vector.multi_reduction <add>, %0, %cst [1] : vector<128x128xf32> to vector<128xf32>
    %2 = vector.shape_cast %1 : vector<128xf32> to vector<128x1xf32>
    %cst_1 = arith.constant 1.000000e+00 : f32
    %3 = vector.broadcast %cst_1 : f32 to vector<128x1xf32>
    %4 = arith.addf %2, %3 : vector<128x1xf32>
    %5 = math.rsqrt %4 : vector<128x1xf32>
    %6 = arith.mulf %5, %5 : vector<128x1xf32>
    %7 = arith.truncf %0 : vector<128x128xf32> to vector<128x128xbf16>
    %c0_2 = arith.constant 0 : index
    %c0_3 = arith.constant 0 : index
    %8 = vector.load %arg0[%c0_2, %c0_3] : memref<128x32xf32, #tpu.memory_space<vmem>>, vector<128x32xf32>
    %c0_4 = arith.constant 0 : index
    %c0_5 = arith.constant 0 : index
    %9 = vector.load %arg2[%c0_4, %c0_5] : memref<32x128xf32, #tpu.memory_space<vmem>>, vector<32x128xf32>
    %cst_6 = arith.constant dense<0.000000e+00> : vector<128x128xf32>
    %10 = tpu.matmul %8, %9, %cst_6 {dimension_numbers = #tpu.dot_dimension_numbers<[1], [0], [0], [1], [0, 0, 1, 1], [], []>} : vector<128x32xf32>, vector<32x128xf32>, vector<128x128xf32> -> vector<128x128xf32>
    %11 = vector.broadcast %5 : vector<128x1xf32> to vector<128x128xf32>
    %12 = arith.mulf %11, %10 : vector<128x128xf32>
    %13 = arith.truncf %12 : vector<128x128xf32> to vector<128x128xbf16>
    %cst_7 = arith.constant dense<0.000000e+00> : vector<128x128xf32>
    %14 = tpu.matmul %7, %13, %cst_7 {dimension_numbers = #tpu.dot_dimension_numbers<[1], [0], [0], [1], [0, 0, 1, 1], [], []>} : vector<128x128xbf16>, vector<128x128xbf16>, vector<128x128xf32> -> vector<128x128xf32>
    %15 = vector.broadcast %5 : vector<128x1xf32> to vector<128x128xf32>
    %16 = arith.mulf %15, %14 : vector<128x128xf32>
    %17 = vector.broadcast %6 : vector<128x1xf32> to vector<128x128xf32>
    %18 = arith.mulf %17, %10 : vector<128x128xf32>
    %19 = arith.addf %16, %18 : vector<128x128xf32>
    %c0_8 = arith.constant 0 : index
    %c0_9 = arith.constant 0 : index
    %c0_10 = arith.constant 0 : index
    %20 = vector.load %arg4[%c0_8, %c0_9, %c0_10] : memref<3x128x128xf32, #tpu.memory_space<vmem>>, vector<1x128x128xf32>
    %21 = vector.shape_cast %20 : vector<1x128x128xf32> to vector<128x128xf32>
    %22 = vector.shape_cast %19 : vector<128x128xf32> to vector<1x128x128xf32>
    tpu.vector_store %arg4[%c0_8, %c0_9, %c0_10], %22 {strides = array<i32>} : memref<3x128x128xf32, #tpu.memory_space<vmem>>, vector<1x128x128xf32>,
    %23 = vector.broadcast %5 : vector<128x1xf32> to vector<128x128xf32>
    %24 = arith.mulf %23, %19 : vector<128x128xf32>
    %25 = arith.truncf %24 : vector<128x128xf32> to vector<128x128xbf16>
    %cst_11 = arith.constant dense<0.000000e+00> : vector<128x128xf32>
    %26 = tpu.matmul %7, %25, %cst_11 {dimension_numbers = #tpu.dot_dimension_numbers<[1], [0], [0], [1], [0, 0, 1, 1], [], []>} : vector<128x128xbf16>, vector<128x128xbf16>, vector<128x128xf32> -> vector<128x128xf32>
    %27 = vector.broadcast %5 : vector<128x1xf32> to vector<128x128xf32>
    %28 = arith.mulf %27, %26 : vector<128x128xf32>
    %29 = vector.broadcast %6 : vector<128x1xf32> to vector<128x128xf32>
    %30 = arith.mulf %29, %19 : vector<128x128xf32>
    %31 = arith.addf %28, %30 : vector<128x128xf32>
    %c1 = arith.constant 1 : index
    %c0_12 = arith.constant 0 : index
    %c0_13 = arith.constant 0 : index
    %32 = vector.load %arg4[%c1, %c0_12, %c0_13] : memref<3x128x128xf32, #tpu.memory_space<vmem>>, vector<1x128x128xf32>
    %33 = vector.shape_cast %32 : vector<1x128x128xf32> to vector<128x128xf32>
    %34 = vector.shape_cast %31 : vector<128x128xf32> to vector<1x128x128xf32>
    tpu.vector_store %arg4[%c1, %c0_12, %c0_13], %34 {strides = array<i32>} : memref<3x128x128xf32, #tpu.memory_space<vmem>>, vector<1x128x128xf32>,
    %35 = vector.broadcast %5 : vector<128x1xf32> to vector<128x128xf32>
    %36 = arith.mulf %35, %31 : vector<128x128xf32>
    %37 = arith.truncf %36 : vector<128x128xf32> to vector<128x128xbf16>
    %cst_14 = arith.constant dense<0.000000e+00> : vector<128x128xf32>
    %38 = tpu.matmul %7, %37, %cst_14 {dimension_numbers = #tpu.dot_dimension_numbers<[1], [0], [0], [1], [0, 0, 1, 1], [], []>} : vector<128x128xbf16>, vector<128x128xbf16>, vector<128x128xf32> -> vector<128x128xf32>
    %39 = vector.broadcast %5 : vector<128x1xf32> to vector<128x128xf32>
    %40 = arith.mulf %39, %38 : vector<128x128xf32>
    %41 = vector.broadcast %6 : vector<128x1xf32> to vector<128x128xf32>
    %42 = arith.mulf %41, %31 : vector<128x128xf32>
    %43 = arith.addf %40, %42 : vector<128x128xf32>
    %c2 = arith.constant 2 : index
    %c0_15 = arith.constant 0 : index
    %c0_16 = arith.constant 0 : index
    %44 = vector.load %arg4[%c2, %c0_15, %c0_16] : memref<3x128x128xf32, #tpu.memory_space<vmem>>, vector<1x128x128xf32>
    %45 = vector.shape_cast %44 : vector<1x128x128xf32> to vector<128x128xf32>
    %46 = vector.shape_cast %43 : vector<128x128xf32> to vector<1x128x128xf32>
    tpu.vector_store %arg4[%c2, %c0_15, %c0_16], %46 {strides = array<i32>} : memref<3x128x128xf32, #tpu.memory_space<vmem>>, vector<1x128x128xf32>,
    %47 = tpu.iota {dimensions = array<i32: 1>} : vector<1x128xi32>
    %c16_i32 = arith.constant 16 : i32
    %48 = vector.broadcast %c16_i32 : i32 to vector<1x128xi32>
    %49 = arith.cmpi slt, %47, %48 : vector<1x128xi32>
    %cst_17 = arith.constant -1.000000e+30 : f32
    %50 = vector.shape_cast %49 : vector<1x128xi1> to vector<1x128xi1>
    %51 = vector.broadcast %50 : vector<1x128xi1> to vector<128x128xi1>
    %52 = vector.broadcast %cst_17 : f32 to vector<128x128xf32>
    %53 = arith.select %51, %43, %52 : vector<128x128xi1>, vector<128x128xf32>
    %cst_18 = arith.constant dense<0xFF800000> : vector<128xf32>
    %54 = vector.multi_reduction <maximumf>, %53, %cst_18 [1] : vector<128x128xf32> to vector<128xf32>
    %55 = vector.shape_cast %54 : vector<128xf32> to vector<128x1xf32>
    %56 = vector.broadcast %55 : vector<128x1xf32> to vector<128x128xf32>
    %57 = arith.subf %53, %56 : vector<128x128xf32>
    %58 = math.exp %57 : vector<128x128xf32>
    %cst_19 = arith.constant 0.000000e+00 : f32
    %59 = vector.shape_cast %49 : vector<1x128xi1> to vector<1x128xi1>
    %60 = vector.broadcast %59 : vector<1x128xi1> to vector<128x128xi1>
    %61 = vector.broadcast %cst_19 : f32 to vector<128x128xf32>
    %62 = arith.select %60, %58, %61 : vector<128x128xi1>, vector<128x128xf32>
    %cst_20 = arith.constant dense<0.000000e+00> : vector<128xf32>
    %63 = vector.multi_reduction <add>, %62, %cst_20 [1] : vector<128x128xf32> to vector<128xf32>
    %64 = vector.shape_cast %63 : vector<128xf32> to vector<128x1xf32>
    %65 = math.log %64 : vector<128x1xf32>
    %66 = vector.broadcast %65 : vector<128x1xf32> to vector<128x128xf32>
    %67 = arith.subf %57, %66 : vector<128x128xf32>
    %cst_21 = arith.constant 0.000000e+00 : f32
    %68 = vector.shape_cast %49 : vector<1x128xi1> to vector<1x128xi1>
    %69 = vector.broadcast %68 : vector<1x128xi1> to vector<128x128xi1>
    %70 = vector.broadcast %cst_21 : f32 to vector<128x128xf32>
    %71 = arith.select %69, %67, %70 : vector<128x128xi1>, vector<128x128xf32>
    %c0_22 = arith.constant 0 : index
    %c0_23 = arith.constant 0 : index
    %72 = vector.load %arg3[%c0_22, %c0_23] : memref<128x128xf32, #tpu.memory_space<vmem>>, vector<128x128xf32>
    tpu.vector_store %arg3[%c0_22, %c0_23], %71 {strides = array<i32>} : memref<128x128xf32, #tpu.memory_space<vmem>>, vector<128x128xf32>,
    return
  }
}

</mosaic_0001>

<bundles_post_ra>
// kernel: tpu_custom_call.1
= control target key start
LH: loop header
LB: loop body
LE: loop exit
PB: predicated region body
PF: predicated region fallthrough
CT: control target
= control target key end

     0   :  { %10 = vsyncpa [#allocation3], 0  ;;  %vm143_vm0 = vcmask 261120   ;;  %s2433_s0 = inlined_call_operand.vmem [shape: f32[128,32], index: 0, kind: input, shape index: {}]   ;;  %s2434_s1 = inlined_call_operand.vmem [shape: f32[128,128], index: 1, kind: input, shape index: {}]   ;;  %s2435_s2 = inlined_call_operand.vmem [shape: f32[32,128], index: 2, kind: input, shape index: {}]   ;;  %s2436_s3 = inlined_call_operand.hbm [shape: f32[128,128], index: 3, kind: output, shape index: {0}]   ;;  %s2437_s4 = inlined_call_operand.hbm [shape: f32[3,128,128], index: 4, kind: output, shape index: {1}]  }
   0x1   :  { %v139_v0 = vld [vmem:[%s2435_s2] sm:$0xff]  ;;  %v140_v1 = vld [vmem:[%s2435_s2 + $0x8] sm:$0xff]  ;;  %v141_v2 = vld [vmem:[%s2435_s2 + $0x10] sm:$0xff] }
   0x2   :  { %v1367_v3 = vpack.c.bf16 %v140_v1, %v139_v0  ;;  %v142_v4 = vld [vmem:[%s2435_s2 + $0x18] sm:$0xff]  ;;  %v123_v5 = vld [vmem:[%s2433_s0] sm:$0xff]  ;;  %v124_v7 = vld [vmem:[%s2433_s0 + $0x8] sm:$0xff] }
   0x3   :  { %v1371_v6 = vpack.c.bf16 %v142_v4, %v141_v2  ;;  %1247 = vmatprep.mubr.msk.f32.mxu0 %vm143_vm0, %v123_v5  ;;  %v19_v8 = vld [vmem:[%s2434_s1] sm:$0xff]  ;;  %v125_v9 = vld [vmem:[%s2433_s0 + $0x10] sm:$0xff]  ;;  %v20_v11 = vld [vmem:[%s2434_s1 + $0x8] sm:$0xff] }
   0x4   :  { %1368 = vmatprep.subr.bf16.mxu0 %v1367_v3  ;;  %35 = vadd.xlane.f32.xlu0 %v19_v8  ;;  %v21_v10 = vld [vmem:[%s2434_s1 + $0x10] sm:$0xff]  ;;  %v22_v12 = vld [vmem:[%s2434_s1 + $0x18] sm:$0xff]  ;;  %v1602_v13 = vpack.c.bf16 %v20_v11, %v19_v8  ;;  %v24_v15 = vld [vmem:[%s2434_s1 + $0x28] sm:$0xff] }
   0x5   :  { %1370 = vmatpush3.bf16.msra.mxu0 %v1367_v3  ;;  %39 = vadd.xlane.f32.xlu1 %v21_v10  ;;  %v1604_v14 = vpack.c.bf16 %v22_v12, %v21_v10  ;;  %v23_v16 = vld [vmem:[%s2434_s1 + $0x20] sm:$0xff]  ;;  %v26_v17 = vld [vmem:[%s2434_s1 + $0x38] sm:$0xff]  ;;  %v25_v19 = vld [vmem:[%s2434_s1 + $0x30] sm:$0xff] }
   0x6   :  { %1372 = vmatprep.subr.bf16.mxu0 %v1371_v6  ;;  %v1615_v18 = vpack.c.bf16 %v24_v15, %v23_v16  ;;  %v28_v20 = vld [vmem:[%s2434_s1 + $0x48] sm:$0xff]  ;;  %v27_v21 = vld [vmem:[%s2434_s1 + $0x40] sm:$0xff]  ;;  %v1626_v22 = vpack.c.bf16 %v26_v17, %v25_v19  ;;  %v30_v24 = vld [vmem:[%s2434_s1 + $0x58] sm:$0xff]  ;;  %1287 = vmatprep.mubr.bf16.mxu1 %v1602_v13 }
   0x7   :  { %v1628_v23 = vpack.c.bf16 %v28_v20, %v27_v21  ;;  %v29_v25 = vld [vmem:[%s2434_s1 + $0x50] sm:$0xff]  ;;  %v32_v26 = vld [vmem:[%s2434_s1 + $0x68] sm:$0xff]  ;;  %v31_v28 = vld [vmem:[%s2434_s1 + $0x60] sm:$0xff] }
   0x8   :  { %37 = vadd.xlane.f32.xlu0 %v20_v11  ;;  %v1641_v27 = vpack.c.bf16 %v30_v24, %v29_v25  ;;  %v34_v29 = vld [vmem:[%s2434_s1 + $0x78] sm:$0xff]  ;;  %v33_v30 = vld [vmem:[%s2434_s1 + $0x70] sm:$0xff]  ;;  %v1656_v32 = vpack.c.bf16 %v32_v26, %v31_v28 }
   0x9   :  { %1374 = vmatpush3.bf16.msra.mxu0 %v1371_v6  ;;  %v126_v31 = vld [vmem:[%s2433_s0 + $0x18] sm:$0xff]  ;;  %41 = vadd.xlane.f32.xlu1 %v22_v12  ;;  %v1658_v33 = vpack.c.bf16 %v34_v29, %v33_v30 }
   0xc   :  { %1248 = vmatmul.mubr.msk.f32.vlgmr.msra.gmra.mrb[0].mxu0 %vm143_vm0, %v124_v7 }
   0xd   :  { %1250 = vmatprep.mubr.msk.f32.mxu0 %vm143_vm0, %v125_v9 }
   0xe   :  { %11 = vsyncpa [#allocation5], 0  ;;  %v127_v34 = vld [vmem:[%s2433_s0 + $0x20] sm:$0xff]  ;;  %43 = vadd.xlane.f32.xlu0 %v23_v16  ;;  %v128_v35 = vld [vmem:[%s2433_s0 + $0x28] sm:$0xff]  ;;  %45 = vadd.xlane.f32.xlu1 %v24_v15 }
   0xf   :  { %v129_v36 = vld [vmem:[%s2433_s0 + $0x30] sm:$0xff]  ;;  %v130_v37 = vld [vmem:[%s2433_s0 + $0x38] sm:$0xff]  ;;  %v131_v38 = vld [vmem:[%s2433_s0 + $0x40] sm:$0xff] }
  0x10   :  { %1251 = vmatmul.mubr.msk.f32.gmra.mrb[2].mxu0 %vm143_vm0, %v126_v31  ;;  %v132_v39 = vld [vmem:[%s2433_s0 + $0x48] sm:$0xff]  ;;  %v133_v40 = vld [vmem:[%s2433_s0 + $0x50] sm:$0xff]  ;;  %v134_v41 = vld [vmem:[%s2433_s0 + $0x58] sm:$0xff] }
  0x11   :  { %1253 = vmatprep.mubr.msk.f32.mxu0 %vm143_vm0, %v127_v34  ;;  %v135_v42 = vld [vmem:[%s2433_s0 + $0x60] sm:$0xff]  ;;  %v136_v43 = vld [vmem:[%s2433_s0 + $0x68] sm:$0xff]  ;;  %v137_v44 = vld [vmem:[%s2433_s0 + $0x70] sm:$0xff] }
  0x12   :  { %47 = vadd.xlane.f32.xlu0 %v25_v19  ;;  %49 = vadd.xlane.f32.xlu1 %v26_v17  ;;  %v138_v45 = vld [vmem:[%s2433_s0 + $0x78] sm:$0xff]  ;;  %s1539_s0 = smov [#allocation4]  }
  0x13   :  { %s1140_s5 = sshll.u32 %s1539_s0, 4  ;;  %s1141_s5 = int_to_ptr.vmem [resolvable:$true] %s1140_s5 }
  0x14   :  { %1254 = vmatmul.mubr.msk.f32.gmra.mrb[4].mxu0 %vm143_vm0, %v128_v35  ;;  %s1491_s6 = scalar_lea.vmem %s1141_s5, 6144  ;;  %p1496_p1 = scmp.lt.s32.totalorder %s1141_s5, %s1141_s5 }
  0x15   :  { %1256 = vmatprep.mubr.msk.f32.mxu0 %vm143_vm0, %v129_v36  ;;  %p1492_p0 = scmp.ne.s32.totalorder %s1141_s5, %s1491_s6  ;;  %p1497_p2 = scmp.lt.s32.totalorder %s1491_s6, %s1491_s6 }
  0x16   :  { %51 = vadd.xlane.f32.xlu0 %v27_v21  ;;  %53 = vadd.xlane.f32.xlu1 %v28_v20 }
  0x17   :  { %p1498_p3 = por %p1497_p2, %p1496_p1 }
  0x18   :  { %1257 = vmatmul.mubr.msk.f32.gmra.mrb[6].mxu0 %vm143_vm0, %v130_v37 }
  0x19   :  { %1259 = vmatprep.mubr.msk.f32.mxu0 %vm143_vm0, %v131_v38  ;;  %p1499_p4 = pnand %p1498_p3, %p1492_p0 }
  0x1a   :  { %55 = vadd.xlane.f32.xlu0 %v29_v25  ;;  %57 = vadd.xlane.f32.xlu1 %v30_v24 }
  0x1c   :  { %1260 = vmatmul.mubr.msk.f32.gmra.mrb[8].mxu0 %vm143_vm0, %v132_v39 }
  0x1d   :  { %1262 = vmatprep.mubr.msk.f32.mxu0 %vm143_vm0, %v133_v40 }
  0x1e   :  { %59 = vadd.xlane.f32.xlu0 %v31_v28  ;;  %61 = vadd.xlane.f32.xlu1 %v32_v26 }
  0x20   :  { %1263 = vmatmul.mubr.msk.f32.gmra.mrb[10].mxu0 %vm143_vm0, %v134_v41 }
  0x21   :  { %1265 = vmatprep.mubr.msk.f32.mxu0 %vm143_vm0, %v135_v42 }
  0x22   :  { %63 = vadd.xlane.f32.xlu0 %v33_v30  ;;  %65 = vadd.xlane.f32.xlu1 %v34_v29 }
  0x24   :  { %1266 = vmatmul.mubr.msk.f32.gmra.mrb[12].mxu0 %vm143_vm0, %v136_v43 }
  0x25   :  { %1268 = vmatprep.mubr.msk.f32.mxu0 %vm143_vm0, %v137_v44 }
  0x28   :  { %1269 = vmatmul.mubr.msk.f32.gmra.mrb[14].mxu0 %vm143_vm0, %v138_v45 }
  0x29   :  { %1319 = vmatprep.mubr.bf16.mxu0 %v1602_v13 }
  0x91   :  { %v36_v47 = vpop.xlane.xlu0 %35 }
  0x92   :  { %v40_v46 = vpop.xlane.xlu1 %39  ;;  %v67_v53 = vadd.f32 1.0, %v36_v47 }
  0x93   :  { %v69_v57 = vadd.f32 1.0, %v40_v46 }
  0x95   :  { %v38_v49 = vpop.xlane.xlu0 %37 }
  0x96   :  { %v42_v48 = vpop.xlane.xlu1 %41  ;;  %v68_v52 = vadd.f32 1.0, %v38_v49 }
  0x97   :  { %v70_v56 = vadd.f32 1.0, %v42_v48 }
  0x98   :  { %1395 = vrsqrt.f32 %v68_v52 }
  0x99   :  { %1397 = vrsqrt.f32 %v67_v53 }
  0x9a   :  { %1399 = vrsqrt.f32 %v70_v56 }
  0x9b   :  { %v46_v50 = vpop.xlane.xlu1 %45  ;;  %v44_v51 = vpop.xlane.xlu0 %43  ;;  %1401 = vrsqrt.f32 %v69_v57 }
  0x9c   :  { %v72_v59 = vadd.f32 1.0, %v46_v50  ;;  %v71_v61 = vadd.f32 1.0, %v44_v51 }
  0x9e   :  { %1403 = vrsqrt.f32 %v72_v59 }
  0x9f   :  { %v50_v54 = vpop.xlane.xlu1 %49  ;;  %v48_v55 = vpop.xlane.xlu0 %47  ;;  %1405 = vrsqrt.f32 %v71_v61 }
  0xa0   :  { %v74_v62 = vadd.f32 1.0, %v50_v54  ;;  %v73_v63 = vadd.f32 1.0, %v48_v55 }
  0xa2   :  { %v1710_v1 = vpop.eup %1395  ;;  %1407 = vrsqrt.f32 %v74_v62 }
  0xa3   :  { %v54_v58 = vpop.xlane.xlu1 %53  ;;  %v52_v60 = vpop.xlane.xlu0 %51  ;;  %2457 = vst [vmem:[#allocation8_spill] sm:$0xff] %v1710_v1  ;;  %1409 = vrsqrt.f32 %v73_v63 }
  0xa4   :  { %v1714_v4 = vpop.eup %1397  ;;  %v76_v8 = vadd.f32 1.0, %v54_v58  ;;  %v75_v9 = vadd.f32 1.0, %v52_v60 }
  0xa5   :  { %v1722_v10 = vpop.eup %1399 }
  0xa6   :  { %2458 = vst [vmem:[#allocation9_spill] sm:$0xff] %v1722_v10  ;;  %v1726_v15 = vpop.eup %1401  ;;  %1411 = vrsqrt.f32 %v76_v8 }
  0xa7   :  { %v58_v0 = vpop.xlane.xlu1 %57  ;;  %v56_v3 = vpop.xlane.xlu0 %55  ;;  %1413 = vrsqrt.f32 %v75_v9 }
  0xa8   :  { %v78_v21 = vadd.f32 1.0, %v58_v0  ;;  %v77_v25 = vadd.f32 1.0, %v56_v3  ;;  %v1734_v26 = vpop.eup %1403 }
  0xa9   :  { %2459 = vst [vmem:[#allocation10_spill] sm:$0xff] %v1734_v26  ;;  %v1738_v30 = vpop.eup %1405 }
  0xaa   :  { %1415 = vrsqrt.f32 %v78_v21 }
  0xab   :  { %v62_v19 = vpop.xlane.xlu1 %61  ;;  %v60_v24 = vpop.xlane.xlu0 %59  ;;  %1417 = vrsqrt.f32 %v77_v25 }
  0xac   :  { %v80_v36 = vadd.f32 1.0, %v62_v19  ;;  %v79_v37 = vadd.f32 1.0, %v60_v24  ;;  %v1746_v39 = vpop.eup %1407 }
  0xad   :  { %2460 = vst [vmem:[#allocation11_spill] sm:$0xff] %v1746_v39  ;;  %v1750_v43 = vpop.eup %1409 }
  0xae   :  { %1419 = vrsqrt.f32 %v80_v36  ;;  %v1824_v36 = vmul.f32 %v1710_v1, %v1710_v1 }
  0xaf   :  { %v66_v38 = vpop.xlane.xlu1 %65  ;;  %v64_v42 = vpop.xlane.xlu0 %63  ;;  %1421 = vrsqrt.f32 %v79_v37  ;;  %v1828_v37 = vmul.f32 %v1714_v4, %v1714_v4 }
  0xb0   :  { %v82_v47 = vadd.f32 1.0, %v66_v38  ;;  %v81_v48 = vadd.f32 1.0, %v64_v42  ;;  %v1758_v49 = vpop.eup %1411 }
  0xb1   :  { %v1762_v52 = vpop.eup %1413 }
  0xb2   :  { %1423 = vrsqrt.f32 %v82_v47 }
  0xb3   :  { %1425 = vrsqrt.f32 %v81_v48 }
  0xb4   :  { %v1770_v56 = vpop.eup %1415 }
  0xb5   :  { %v1774_v59 = vpop.eup %1417 }
  0xb8   :  { %v1782_v63 = vpop.eup %1419 }
  0xdf   :  { %v1712_v2 = vpop.f32.mrb[0].mxu0 }
  0xe0   :  { %v338_v5 = vmul.f32 %v1710_v1, %v1712_v2  ;;  %v1718_v6 = vpop.f32.mrb[1].mxu0 }
  0xe1   :  { %v337_v7 = vmul.f32 %v1714_v4, %v1718_v6 }
  0xe3   :  { %v1724_v11 = vpop.f32.mrb[2].mxu0  ;;  %v353_v12 = vpack.c.bf16 %v338_v5, %v337_v7  ;;  %v1786_v5 = vpop.eup %1421 }
  0xe4   :  { %v340_v16 = vmul.f32 %v1722_v10, %v1724_v11  ;;  %v1730_v17 = vpop.f32.mrb[3].mxu0 }
  0xe5   :  { %v339_v20 = vmul.f32 %v1726_v15, %v1730_v17  ;;  %1271 = vmatprep.subr.bf16.mxu1 %v353_v12 }
  0xe6   :  { %1272 = vmatpush3.bf16.msra.mxu1 %v353_v12  ;;  %v1794_v12 = vpop.eup %1423 }
  0xe7   :  { %v354_v28 = vpack.c.bf16 %v340_v16, %v339_v20  ;;  %v1736_v29 = vpop.f32.mrb[4].mxu0  ;;  %v1798_v20 = vpop.eup %1425 }
  0xe8   :  { %v342_v31 = vmul.f32 %v1734_v26, %v1736_v29  ;;  %v1742_v34 = vpop.f32.mrb[5].mxu0 }
  0xe9   :  { %v341_v35 = vmul.f32 %v1738_v30, %v1742_v34  ;;  %1273 = vmatprep.subr.bf16.mxu1 %v354_v28 }
  0xea   :  { %1274 = vmatpush3.bf16.msra.mxu1 %v354_v28 }
  0xeb   :  { %v355_v40 = vpack.c.bf16 %v342_v31, %v341_v35  ;;  %v1748_v41 = vpop.f32.mrb[6].mxu0  ;;  %v1816_v31 = vmul.f32 %v1722_v10, %v1722_v10  ;;  %v1820_v35 = vmul.f32 %v1726_v15, %v1726_v15 }
  0xec   :  { %v344_v44 = vmul.f32 %v1746_v39, %v1748_v41  ;;  %v1754_v45 = vpop.f32.mrb[7].mxu0 }
  0xed   :  { %v343_v46 = vmul.f32 %v1750_v43, %v1754_v45  ;;  %1275 = vmatprep.subr.bf16.mxu1 %v355_v40 }
  0xee   :  { %1276 = vmatpush3.bf16.msra.mxu1 %v355_v40  ;;  %v476_v40 = vmul.f32 %v1730_v17, %v1820_v35  ;;  %v475_v17 = vmul.f32 %v1712_v2, %v1824_v36  ;;  %v1862_v2 = vmul.f32 %v1746_v39, %v1746_v39 }
  0xef   :  { %v356_v50 = vpack.c.bf16 %v344_v44, %v343_v46  ;;  %v1760_v51 = vpop.f32.mrb[8].mxu0  ;;  %v474_v46 = vmul.f32 %v1718_v6, %v1828_v37  ;;  %v1848_v6 = vmul.f32 %v1750_v43, %v1750_v43 }
  0xf0   :  { %v346_v53 = vmul.f32 %v1758_v49, %v1760_v51  ;;  %v1766_v54 = vpop.f32.mrb[9].mxu0  ;;  %2462 = vst [vmem:[#allocation13_spill] sm:$0xff] %v1862_v2 }
  0xf1   :  { %v345_v55 = vmul.f32 %v1762_v52, %v1766_v54  ;;  %1277 = vmatprep.subr.bf16.mxu1 %v356_v50 }
  0xf2   :  { %1278 = vmatpush3.bf16.msra.mxu1 %v356_v50  ;;  %v477_v50 = vmul.f32 %v1724_v11, %v1816_v31  ;;  %v1855_v11 = vmul.f32 %v1738_v30, %v1738_v30 }
  0xf3   :  { %v357_v57 = vpack.c.bf16 %v346_v53, %v345_v55  ;;  %v1772_v58 = vpop.f32.mrb[10].mxu0 }
  0xf4   :  { %v348_v60 = vmul.f32 %v1770_v56, %v1772_v58  ;;  %v1778_v61 = vpop.f32.mrb[11].mxu0 }
  0xf5   :  { %v347_v62 = vmul.f32 %v1774_v59, %v1778_v61  ;;  %1279 = vmatprep.subr.bf16.mxu1 %v357_v57 }
  0xf6   :  { %1280 = vmatpush3.bf16.msra.mxu1 %v357_v57 }
  0xf7   :  { %v358_v0 = vpack.c.bf16 %v348_v60, %v347_v62  ;;  %v1784_v3 = vpop.f32.mrb[12].mxu0 }
  0xf8   :  { %v350_v7 = vmul.f32 %v1782_v63, %v1784_v3  ;;  %v1790_v8 = vpop.f32.mrb[13].mxu0 }
  0xf9   :  { %v349_v9 = vmul.f32 %v1786_v5, %v1790_v8  ;;  %1281 = vmatprep.subr.bf16.mxu1 %v358_v0 }
  0xfa   :  { %1282 = vmatpush3.bf16.msra.mxu1 %v358_v0 }
  0xfb   :  { %v359_v16 = vpack.c.bf16 %v350_v7, %v349_v9  ;;  %v1796_v19 = vpop.f32.mrb[14].mxu0 }
  0xfc   :  { %v352_v21 = vmul.f32 %v1794_v12, %v1796_v19  ;;  %v1802_v24 = vpop.f32.mrb[15].mxu0 }
  0xfd   :  { %v351_v25 = vmul.f32 %v1798_v20, %v1802_v24  ;;  %1283 = vmatprep.subr.bf16.mxu1 %v359_v16 }
  0xfe   :  { %1284 = vmatpush3.bf16.msra.mxu1 %v359_v16 }
  0xff   :  { %v360_v28 = vpack.c.bf16 %v352_v21, %v351_v25  ;;  %v1871_v21 = vmul.f32 %v1734_v26, %v1734_v26 }
 0x101   :  { %1285 = vmatprep.subr.bf16.mxu1 %v360_v28  ;;  %2463 = vst [vmem:[#allocation14_spill] sm:$0xff] %v1871_v21 }
 0x102   :  { %1286 = vmatpush3.bf16.msra.mxu1 %v360_v28 }
 0x105   :  { %1288 = vmatmul.mubr.bf16.vlgmr.msra.gmra.mrb[0].mxu1 %v1604_v14 }
 0x106   :  { %1291 = vmatprep.mubr.bf16.mxu1 %v1615_v18 }
 0x10d   :  { %1292 = vmatmul.mubr.bf16.gmra.mrb[4].mxu1 %v1626_v22 }
 0x10e   :  { %1295 = vmatprep.mubr.bf16.mxu1 %v1628_v23 }
 0x115   :  { %1296 = vmatmul.mubr.bf16.gmra.mrb[8].mxu1 %v1641_v27 }
 0x116   :  { %1299 = vmatprep.mubr.bf16.mxu1 %v1656_v32 }
 0x11d   :  { %1300 = vmatmul.mubr.bf16.gmra.mrb[12].mxu1 %v1658_v33 }
 0x11e   :  { %1355 = vmatprep.mubr.bf16.mxu1 %v1615_v18 }
 0x1d8   :  { %v1289_v38 = vpop.f32.mrb[0].mxu1 }
 0x1d9   :  { %v460_v42 = vmul.f32 %v1726_v15, %v1289_v38  ;;  %v395_v44 = vpop.f32.mrb[1].mxu1 }
 0x1da   :  { %v458_v47 = vmul.f32 %v1714_v4, %v395_v44  ;;  %v1290_v48 = vpop.f32.mrb[2].mxu1 }
 0x1db   :  { %v1838_v53 = vadd.f32 %v476_v40, %v460_v42  ;;  %v461_v55 = vmul.f32 %v1722_v10, %v1290_v48  ;;  %v398_v57 = vpop.f32.mrb[3].mxu1  ;;  %v480_v40 = vmul.f32 %v1754_v45, %v1848_v6  ;;  %v479_v45 = vmul.f32 %v1736_v29, %v1871_v21 }
 0x1dc   :  { %v1843_v60 = vadd.f32 %v474_v46, %v458_v47  ;;  %v459_v62 = vmul.f32 %v1710_v1, %v398_v57  ;;  %v478_v47 = vmul.f32 %v1742_v34, %v1855_v11  ;;  %v481_v57 = vmul.f32 %v1748_v41, %v1862_v2 }
 0x1dd   :  { %508 = vst [vmem:[#allocation4 + $0x10] sm:$0xff] %v1838_v53  ;;  %v1851_v0 = vadd.f32 %v477_v50, %v461_v55  ;;  %v524_v9 = vmul.f32 %v1726_v15, %v1838_v53  ;;  %v1896_v34 = vmul.f32 %v1774_v59, %v1774_v59 }
 0x1de   :  { %506 = vst [vmem:[#allocation4] sm:$0xff] %v1843_v60  ;;  %v1858_v7 = vadd.f32 %v475_v17, %v459_v62  ;;  %v522_v28 = vmul.f32 %v1714_v4, %v1843_v60 }
 0x1df   :  { %509 = vst [vmem:[#allocation4 + $0x18] sm:$0xff] %v1851_v0  ;;  %v525_v16 = vmul.f32 %v1722_v10, %v1851_v0 }
 0x1e0   :  { %2461 = vst [vmem:[#allocation12_spill] sm:$0xff] %v1858_v7  ;;  %507 = vst [vmem:[#allocation4 + $0x8] sm:$0xff] %v1858_v7  ;;  %v1293_v25 = vpop.f32.mrb[4].mxu1  ;;  %v523_v38 = vmul.f32 %v1710_v1, %v1858_v7 }
 0x1e1   :  { %v464_v42 = vmul.f32 %v1750_v43, %v1293_v25  ;;  %v411_v44 = vpop.f32.mrb[5].mxu1  ;;  %v539_v46 = vpack.c.bf16 %v525_v16, %v524_v9  ;;  %v1903_v16 = vmul.f32 %v1762_v52, %v1762_v52 }
 0x1e2   :  { %v462_v48 = vmul.f32 %v1738_v30, %v411_v44  ;;  %v1294_v50 = vpop.f32.mrb[6].mxu1  ;;  %v538_v55 = vpack.c.bf16 %v523_v38, %v522_v28 }
 0x1e3   :  { %v1886_v17 = vadd.f32 %v480_v40, %v464_v42  ;;  %v465_v62 = vmul.f32 %v1746_v39, %v1294_v50  ;;  %v414_v7 = vpop.f32.mrb[7].mxu1  ;;  %v1919_v40 = vmul.f32 %v1758_v49, %v1758_v49 }
 0x1e4   :  { %v1891_v25 = vadd.f32 %v478_v47, %v462_v48  ;;  %v463_v9 = vmul.f32 %v1734_v26, %v414_v7  ;;  %1303 = vmatprep.subr.bf16.mxu0 %v538_v55  ;;  %v1910_v7 = vmul.f32 %v1770_v56, %v1770_v56  ;;  %v484_v48 = vmul.f32 %v1778_v61, %v1896_v34 }
 0x1e5   :  { %512 = vst [vmem:[#allocation4 + $0x30] sm:$0xff] %v1886_v17  ;;  %v1899_v41 = vadd.f32 %v481_v57, %v465_v62  ;;  %1304 = vmatpush3.bf16.msra.mxu0 %v538_v55  ;;  %v528_v28 = vmul.f32 %v1750_v43, %v1886_v17  ;;  %2467 = vst [vmem:[#allocation18_spill] sm:$0xff] %v1919_v40  ;;  %v482_v62 = vmul.f32 %v1766_v54, %v1903_v16 }
 0x1e6   :  { %510 = vst [vmem:[#allocation4 + $0x20] sm:$0xff] %v1891_v25  ;;  %v1906_v29 = vadd.f32 %v479_v45, %v463_v9  ;;  %1305 = vmatprep.subr.bf16.mxu0 %v539_v46  ;;  %2466 = vst [vmem:[#allocation17_spill] sm:$0xff] %v1910_v7  ;;  %v526_v44 = vmul.f32 %v1738_v30, %v1891_v25  ;;  %v1944_v54 = vmul.f32 %v1798_v20, %v1798_v20 }
 0x1e7   :  { %2464 = vst [vmem:[#allocation15_spill] sm:$0xff] %v1899_v41  ;;  %513 = vst [vmem:[#allocation4 + $0x38] sm:$0xff] %v1899_v41  ;;  %v529_v38 = vmul.f32 %v1746_v39, %v1899_v41  ;;  %v485_v41 = vmul.f32 %v1772_v58, %v1910_v7 }
 0x1e8   :  { %2465 = vst [vmem:[#allocation16_spill] sm:$0xff] %v1906_v29  ;;  %511 = vst [vmem:[#allocation4 + $0x28] sm:$0xff] %v1906_v29  ;;  %v1297_v42 = vpop.f32.mrb[8].mxu1  ;;  %v527_v47 = vmul.f32 %v1734_v26, %v1906_v29 }
 0x1e9   :  { %v468_v50 = vmul.f32 %v1774_v59, %v1297_v42  ;;  %v427_v55 = vpop.f32.mrb[9].mxu1  ;;  %1306 = vmatpush3.bf16.msra.mxu0 %v539_v46  ;;  %v541_v57 = vpack.c.bf16 %v529_v38, %v528_v28  ;;  %v483_v42 = vmul.f32 %v1760_v51, %v1919_v40  ;;  %v1951_v38 = vmul.f32 %v1786_v5, %v1786_v5 }
 0x1ea   :  { %v466_v45 = vmul.f32 %v1762_v52, %v427_v55  ;;  %v1298_v9 = vpop.f32.mrb[10].mxu1  ;;  %v540_v21 = vpack.c.bf16 %v527_v47, %v526_v44  ;;  %v1958_v44 = vmul.f32 %v1794_v12, %v1794_v12  ;;  %v488_v55 = vmul.f32 %v1802_v24, %v1944_v54 }
 0x1eb   :  { %v1934_v2 = vadd.f32 %v484_v48, %v468_v50  ;;  %v469_v29 = vmul.f32 %v1770_v56, %v1298_v9  ;;  %v430_v61 = vpop.f32.mrb[11].mxu1 }
 0x1ec   :  { %v1939_v46 = vadd.f32 %v482_v62, %v466_v45  ;;  %v467_v28 = vmul.f32 %v1758_v49, %v430_v61  ;;  %1307 = vmatprep.subr.bf16.mxu0 %v540_v21  ;;  %v486_v61 = vmul.f32 %v1790_v8, %v1951_v38 }
 0x1ed   :  { %516 = vst [vmem:[#allocation4 + $0x50] sm:$0xff] %v1934_v2  ;;  %v1947_v58 = vadd.f32 %v485_v41, %v469_v29  ;;  %1308 = vmatpush3.bf16.msra.mxu0 %v540_v21  ;;  %v532_v41 = vmul.f32 %v1774_v59, %v1934_v2  ;;  %v1967_v29 = vmul.f32 %v1782_v63, %v1782_v63 }
 0x1ee   :  { %514 = vst [vmem:[#allocation4 + $0x40] sm:$0xff] %v1939_v46  ;;  %v1954_v51 = vadd.f32 %v483_v42, %v467_v28  ;;  %1309 = vmatprep.subr.bf16.mxu0 %v541_v57  ;;  %v530_v48 = vmul.f32 %v1762_v52, %v1939_v46 }
 0x1ef   :  { %2468 = vst [vmem:[#allocation19_spill] sm:$0xff] %v1947_v58  ;;  %517 = vst [vmem:[#allocation4 + $0x58] sm:$0xff] %v1947_v58  ;;  %v533_v21 = vmul.f32 %v1770_v56, %v1947_v58  ;;  %v489_v58 = vmul.f32 %v1796_v19, %v1958_v44 }
 0x1f0   :  { %2469 = vst [vmem:[#allocation20_spill] sm:$0xff] %v1954_v51  ;;  %515 = vst [vmem:[#allocation4 + $0x48] sm:$0xff] %v1954_v51  ;;  %v1301_v47 = vpop.f32.mrb[12].mxu1  ;;  %v531_v50 = vmul.f32 %v1758_v49, %v1954_v51 }
 0x1f1   :  { %v472_v62 = vmul.f32 %v1798_v20, %v1301_v47  ;;  %v443_v45 = vpop.f32.mrb[13].mxu1  ;;  %1310 = vmatpush3.bf16.msra.mxu0 %v541_v57  ;;  %v543_v9 = vpack.c.bf16 %v533_v21, %v532_v41  ;;  %v487_v47 = vmul.f32 %v1784_v3, %v1967_v29 }
 0x1f2   :  { %v470_v42 = vmul.f32 %v1786_v5, %v443_v45  ;;  %v1302_v28 = vpop.f32.mrb[14].mxu1  ;;  %v542_v40 = vpack.c.bf16 %v531_v50, %v530_v48 }
 0x1f3   :  { %v1982_v7 = vadd.f32 %v488_v55, %v472_v62  ;;  %v473_v51 = vmul.f32 %v1794_v12, %v1302_v28  ;;  %v446_v24 = vpop.f32.mrb[15].mxu1  ;;  %v661_v62 = vmul.f32 %v1838_v53, %v1820_v35  ;;  %v2470_v53 = vld [vmem:[#allocation12_spill] sm:$0xff] }
 0x1f4   :  { %v1987_v57 = vadd.f32 %v486_v61, %v470_v42  ;;  %v471_v41 = vmul.f32 %v1782_v63, %v446_v24  ;;  %1311 = vmatprep.subr.bf16.mxu0 %v542_v40 }
 0x1f5   :  { %520 = vst [vmem:[#allocation4 + $0x70] sm:$0xff] %v1982_v7  ;;  %v1991_v8 = vadd.f32 %v489_v58, %v473_v51  ;;  %1312 = vmatpush3.bf16.msra.mxu0 %v542_v40  ;;  %v536_v3 = vmul.f32 %v1798_v20, %v1982_v7 }
 0x1f6   :  { %518 = vst [vmem:[#allocation4 + $0x60] sm:$0xff] %v1987_v57  ;;  %v1994_v19 = vadd.f32 %v487_v47, %v471_v41  ;;  %1313 = vmatprep.subr.bf16.mxu0 %v543_v9  ;;  %v534_v58 = vmul.f32 %v1786_v5, %v1987_v57 }
 0x1f7   :  { %521 = vst [vmem:[#allocation4 + $0x78] sm:$0xff] %v1991_v8  ;;  %v537_v21 = vmul.f32 %v1794_v12, %v1991_v8 }
 0x1f8   :  { %519 = vst [vmem:[#allocation4 + $0x68] sm:$0xff] %v1994_v19  ;;  %v535_v40 = vmul.f32 %v1782_v63, %v1994_v19 }
 0x1f9   :  { %1314 = vmatpush3.bf16.msra.mxu0 %v543_v9  ;;  %v545_v51 = vpack.c.bf16 %v537_v21, %v536_v3  ;;  %v659_v9 = vmul.f32 %v1843_v60, %v1828_v37  ;;  %v660_v3 = vmul.f32 %v2470_v53, %v1824_v36  ;;  %v2472_v53 = vld [vmem:[#allocation15_spill] sm:$0xff] }
 0x1fa   :  { %v544_v48 = vpack.c.bf16 %v535_v40, %v534_v58 }
 0x1fc   :  { %1315 = vmatprep.subr.bf16.mxu0 %v544_v48 }
 0x1fd   :  { %1316 = vmatpush3.bf16.msra.mxu0 %v544_v48 }
 0x1fe   :  { %1317 = vmatprep.subr.bf16.mxu0 %v545_v51 }
 0x201   :  { %1318 = vmatpush3.bf16.msra.mxu0 %v545_v51 }
 0x204   :  { %1320 = vmatmul.mubr.bf16.vlgmr.msra.gmra.mrb[16].mxu0 %v1604_v14 }
 0x205   :  { %1323 = vmatprep.mubr.bf16.mxu0 %v1615_v18 }
 0x20c   :  { %1324 = vmatmul.mubr.bf16.gmra.mrb[20].mxu0 %v1626_v22 }
 0x20d   :  { %1327 = vmatprep.mubr.bf16.mxu0 %v1628_v23 }
 0x214   :  { %1328 = vmatmul.mubr.bf16.gmra.mrb[24].mxu0 %v1641_v27 }
 0x215   :  { %1331 = vmatprep.mubr.bf16.mxu0 %v1656_v32 }
 0x21c   :  { %1332 = vmatmul.mubr.bf16.gmra.mrb[28].mxu0 %v1658_v33 }
 0x21d   :  { %1351 = vmatprep.mubr.bf16.mxu0 %v1602_v13  ;;  %v662_v13 = vmul.f32 %v1851_v0, %v1816_v31 }
 0x2d7   :  { %v1321_v50 = vpop.f32.mrb[16].mxu0 }
 0x2d8   :  { %v645_v55 = vmul.f32 %v1726_v15, %v1321_v50  ;;  %v580_v45 = vpop.f32.mrb[17].mxu0 }
 0x2d9   :  { %v643_v18 = vmul.f32 %v1714_v4, %v580_v45  ;;  %v1322_v61 = vpop.f32.mrb[18].mxu0 }
 0x2da   :  { %v2020_v42 = vadd.f32 %v661_v62, %v645_v55  ;;  %v646_v28 = vmul.f32 %v1722_v10, %v1322_v61  ;;  %v583_v24 = vpop.f32.mrb[19].mxu0  ;;  %v665_v55 = vmul.f32 %v1886_v17, %v1848_v6 }
 0x2db   :  { %v2025_v47 = vadd.f32 %v659_v9, %v643_v18  ;;  %v644_v41 = vmul.f32 %v1710_v1, %v583_v24  ;;  %v663_v9 = vmul.f32 %v1891_v25, %v1855_v11 }
 0x2dc   :  { %694 = vst [vmem:[#allocation4 + $0x90] sm:$0xff] %v2020_v42  ;;  %v2031_v21 = vadd.f32 %v662_v13, %v646_v28  ;;  %v710_v58 = vmul.f32 %v1726_v15, %v2020_v42 }
 0x2dd   :  { %692 = vst [vmem:[#allocation4 + $0x80] sm:$0xff] %v2025_v47  ;;  %v2034_v60 = vadd.f32 %v660_v3, %v644_v41  ;;  %v708_v40 = vmul.f32 %v1714_v4, %v2025_v47  ;;  %v2471_v41 = vld [vmem:[#allocation13_spill] sm:$0xff] }
 0x2de   :  { %695 = vst [vmem:[#allocation4 + $0x98] sm:$0xff] %v2031_v21  ;;  %v711_v0 = vmul.f32 %v1722_v10, %v2031_v21  ;;  %v666_v3 = vmul.f32 %v2472_v53, %v2471_v41 }
 0x2df   :  { %693 = vst [vmem:[#allocation4 + $0x88] sm:$0xff] %v2034_v60  ;;  %v709_v51 = vmul.f32 %v1710_v1, %v2034_v60  ;;  %v1325_v48 = vpop.f32.mrb[20].mxu0 }
 0x2e0   :  { %v649_v50 = vmul.f32 %v1750_v43, %v1325_v48  ;;  %v596_v62 = vpop.f32.mrb[21].mxu0  ;;  %v725_v45 = vpack.c.bf16 %v711_v0, %v710_v58  ;;  %v2473_v58 = vld [vmem:[#allocation14_spill] sm:$0xff]  ;;  %v2474_v0 = vld [vmem:[#allocation16_spill] sm:$0xff] }
 0x2e1   :  { %v647_v18 = vmul.f32 %v1738_v30, %v596_v62  ;;  %v1326_v61 = vpop.f32.mrb[22].mxu0  ;;  %v724_v28 = vpack.c.bf16 %v709_v51, %v708_v40  ;;  %v664_v62 = vmul.f32 %v2474_v0, %v2473_v58 }
 0x2e2   :  { %v2052_v13 = vadd.f32 %v665_v55, %v649_v50  ;;  %v650_v24 = vmul.f32 %v1746_v39, %v1326_v61  ;;  %v599_v48 = vpop.f32.mrb[23].mxu0 }
 0x2e3   :  { %v2057_v1 = vadd.f32 %v663_v9, %v647_v18  ;;  %v648_v17 = vmul.f32 %v1734_v26, %v599_v48  ;;  %1335 = vmatprep.subr.bf16.mxu0 %v724_v28  ;;  %1375 = vmatprep.subr.bf16.mxu1 %v724_v28  ;;  %v667_v48 = vmul.f32 %v1939_v46, %v1903_v16 }
 0x2e4   :  { %698 = vst [vmem:[#allocation4 + $0xb0] sm:$0xff] %v2052_v13  ;;  %v2063_v25 = vadd.f32 %v666_v3, %v650_v24  ;;  %1336 = vmatpush3.bf16.msra.mxu0 %v724_v28  ;;  %1383 = vmatpush3.bf16.msra.mxu1 %v724_v28  ;;  %v714_v51 = vmul.f32 %v1750_v43, %v2052_v13 }
 0x2e5   :  { %696 = vst [vmem:[#allocation4 + $0xa0] sm:$0xff] %v2057_v1  ;;  %v2066_v40 = vadd.f32 %v664_v62, %v648_v17  ;;  %1337 = vmatprep.subr.bf16.mxu0 %v725_v45  ;;  %1376 = vmatprep.subr.bf16.mxu1 %v725_v45  ;;  %v712_v55 = vmul.f32 %v1738_v30, %v2057_v1 }
 0x2e6   :  { %699 = vst [vmem:[#allocation4 + $0xb8] sm:$0xff] %v2063_v25  ;;  %v715_v50 = vmul.f32 %v1746_v39, %v2063_v25  ;;  %v669_v28 = vmul.f32 %v1934_v2, %v1896_v34  ;;  %v2476_v39 = vld [vmem:[#allocation17_spill] sm:$0xff] }
 0x2e7   :  { %2475 = vst [vmem:[#allocation12_spill] sm:$0xff] %v2066_v40  ;;  %697 = vst [vmem:[#allocation4 + $0xa8] sm:$0xff] %v2066_v40  ;;  %v713_v18 = vmul.f32 %v1734_v26, %v2066_v40  ;;  %v1329_v9 = vpop.f32.mrb[24].mxu0 }
 0x2e8   :  { %v653_v61 = vmul.f32 %v1774_v59, %v1329_v9  ;;  %v612_v24 = vpop.f32.mrb[25].mxu0  ;;  %1338 = vmatpush3.bf16.msra.mxu0 %v725_v45  ;;  %1384 = vmatpush3.bf16.msra.mxu1 %v725_v45  ;;  %v727_v53 = vpack.c.bf16 %v715_v50, %v714_v51  ;;  %v2477_v9 = vld [vmem:[#allocation19_spill] sm:$0xff]  ;;  %v2478_v51 = vld [vmem:[#allocation18_spill] sm:$0xff]  ;;  %v2479_v50 = vld [vmem:[#allocation20_spill] sm:$0xff] }
 0x2e9   :  { %v651_v3 = vmul.f32 %v1762_v52, %v612_v24  ;;  %v1330_v17 = vpop.f32.mrb[26].mxu0  ;;  %v726_v0 = vpack.c.bf16 %v713_v18, %v712_v55  ;;  %v670_v10 = vmul.f32 %v2477_v9, %v2476_v39  ;;  %v668_v24 = vmul.f32 %v2479_v50, %v2478_v51 }
 0x2ea   :  { %v2084_v62 = vadd.f32 %v669_v28, %v653_v61  ;;  %v654_v26 = vmul.f32 %v1770_v56, %v1330_v17  ;;  %v615_v40 = vpop.f32.mrb[27].mxu0  ;;  %v671_v9 = vmul.f32 %v1987_v57, %v1951_v38 }
 0x2eb   :  { %v2089_v2 = vadd.f32 %v667_v48, %v651_v3  ;;  %v652_v45 = vmul.f32 %v1758_v49, %v615_v40  ;;  %1339 = vmatprep.subr.bf16.mxu0 %v726_v0  ;;  %1377 = vmatprep.subr.bf16.mxu1 %v726_v0  ;;  %v673_v3 = vmul.f32 %v1982_v7, %v1944_v54 }
 0x2ec   :  { %702 = vst [vmem:[#allocation4 + $0xd0] sm:$0xff] %v2084_v62  ;;  %v2095_v46 = vadd.f32 %v670_v10, %v654_v26  ;;  %1340 = vmatpush3.bf16.msra.mxu0 %v726_v0  ;;  %1385 = vmatpush3.bf16.msra.mxu1 %v726_v0  ;;  %v718_v40 = vmul.f32 %v1774_v59, %v2084_v62 }
 0x2ed   :  { %700 = vst [vmem:[#allocation4 + $0xc0] sm:$0xff] %v2089_v2  ;;  %v2098_v55 = vadd.f32 %v668_v24, %v652_v45  ;;  %1341 = vmatprep.subr.bf16.mxu0 %v727_v53  ;;  %1378 = vmatprep.subr.bf16.mxu1 %v727_v53  ;;  %v716_v10 = vmul.f32 %v1762_v52, %v2089_v2 }
 0x2ee   :  { %703 = vst [vmem:[#allocation4 + $0xd8] sm:$0xff] %v2095_v46  ;;  %v719_v18 = vmul.f32 %v1770_v56, %v2095_v46 }
 0x2ef   :  { %2480 = vst [vmem:[#allocation13_spill] sm:$0xff] %v2098_v55  ;;  %701 = vst [vmem:[#allocation4 + $0xc8] sm:$0xff] %v2098_v55  ;;  %v717_v26 = vmul.f32 %v1758_v49, %v2098_v55  ;;  %v1333_v61 = vpop.f32.mrb[28].mxu0 }
 0x2f0   :  { %v657_v28 = vmul.f32 %v1798_v20, %v1333_v61  ;;  %v628_v48 = vpop.f32.mrb[29].mxu0  ;;  %1342 = vmatpush3.bf16.msra.mxu0 %v727_v53  ;;  %1386 = vmatpush3.bf16.msra.mxu1 %v727_v53  ;;  %v729_v17 = vpack.c.bf16 %v719_v18, %v718_v40  ;;  %v674_v61 = vmul.f32 %v1991_v8, %v1958_v44 }
 0x2f1   :  { %v655_v0 = vmul.f32 %v1786_v5, %v628_v48  ;;  %v1334_v45 = vpop.f32.mrb[30].mxu0  ;;  %v728_v50 = vpack.c.bf16 %v717_v26, %v716_v10  ;;  %v672_v40 = vmul.f32 %v1994_v19, %v1967_v29  ;;  %v847_v48 = vmul.f32 %v2020_v42, %v1820_v35 }
 0x2f2   :  { %v2116_v24 = vadd.f32 %v673_v3, %v657_v28  ;;  %v658_v55 = vmul.f32 %v1794_v12, %v1334_v45  ;;  %v631_v51 = vpop.f32.mrb[31].mxu0  ;;  %v894_v28 = vlaneseq  ;;  %v852_v42 = vmul.f32 %v2063_v25, %v2471_v41 }
 0x2f3   :  { %v2121_v7 = vadd.f32 %v671_v9, %v655_v0  ;;  %v656_v53 = vmul.f32 %v1782_v63, %v631_v51  ;;  %1343 = vmatprep.subr.bf16.mxu0 %v728_v50  ;;  %1379 = vmatprep.subr.bf16.mxu1 %v728_v50 }
 0x2f4   :  { %706 = vst [vmem:[#allocation4 + $0xf0] sm:$0xff] %v2116_v24  ;;  %v2127_v57 = vadd.f32 %v674_v61, %v658_v55  ;;  %1344 = vmatpush3.bf16.msra.mxu0 %v728_v50  ;;  %1387 = vmatpush3.bf16.msra.mxu1 %v728_v50  ;;  %v722_v8 = vmul.f32 %v1798_v20, %v2116_v24  ;;  %v2148_v3 = vand.u32 127, %v894_v28 }
 0x2f5   :  { %704 = vst [vmem:[#allocation4 + $0xe0] sm:$0xff] %v2121_v7  ;;  %v2130_v18 = vadd.f32 %v672_v40, %v656_v53  ;;  %1345 = vmatprep.subr.bf16.mxu0 %v729_v17  ;;  %1380 = vmatprep.subr.bf16.mxu1 %v729_v17  ;;  %v720_v51 = vmul.f32 %v1786_v5, %v2121_v7 }
 0x2f6   :  { %707 = vst [vmem:[#allocation4 + $0xf8] sm:$0xff] %v2127_v57  ;;  %v723_v19 = vmul.f32 %v1794_v12, %v2127_v57  ;;  %vm896_vm1 = vcmp.lt.s32.totalorder %v2148_v3, 16 }
 0x2f7   :  { %705 = vst [vmem:[#allocation4 + $0xe8] sm:$0xff] %v2130_v18  ;;  %v721_v55 = vmul.f32 %v1782_v63, %v2130_v18 }
 0x2f8   :  { %1346 = vmatpush3.bf16.msra.mxu0 %v729_v17  ;;  %1388 = vmatpush3.bf16.msra.mxu1 %v729_v17  ;;  %v731_v10 = vpack.c.bf16 %v723_v19, %v722_v8 }
 0x2f9   :  { %v730_v26 = vpack.c.bf16 %v721_v55, %v720_v51 }
 0x2fb   :  { %1347 = vmatprep.subr.bf16.mxu0 %v730_v26  ;;  %1381 = vmatprep.subr.bf16.mxu1 %v730_v26 }
 0x2fc   :  { %1348 = vmatpush3.bf16.msra.mxu0 %v730_v26  ;;  %1389 = vmatpush3.bf16.msra.mxu1 %v730_v26 }
 0x2fd   :  { %1349 = vmatprep.subr.bf16.mxu0 %v731_v10  ;;  %1382 = vmatprep.subr.bf16.mxu1 %v731_v10 }
 0x300   :  { %1350 = vmatpush3.bf16.msra.mxu0 %v731_v10  ;;  %1390 = vmatpush3.bf16.msra.mxu1 %v731_v10 }
 0x303   :  { %1352 = vmatmul.mubr.bf16.vlgmr.msra.gmra.mrb[32].mxu0 %v1604_v14  ;;  %1356 = vmatmul.mubr.bf16.vlgmr.msra.gmra.mrb[16].mxu1 %v1626_v22  ;;  %v848_v14 = vmul.f32 %v2031_v21, %v1816_v31  ;;  %v851_v22 = vmul.f32 %v2052_v13, %v1848_v6  ;;  %v849_v31 = vmul.f32 %v2057_v1, %v1855_v11  ;;  %v2483_v13 = vld [vmem:[#allocation11_spill] sm:$0xff]  ;;  %v2484_v1 = vld [vmem:[#allocation8_spill] sm:$0xff] }
 0x304   :  { %1359 = vmatprep.mubr.bf16.mxu1 %v1628_v23  ;;  %v845_v23 = vmul.f32 %v2025_v47, %v1828_v37 }
 0x30b   :  { %1360 = vmatmul.mubr.bf16.gmra.mrb[20].mxu1 %v1641_v27  ;;  %v846_v27 = vmul.f32 %v2034_v60, %v1824_v36 }
 0x30c   :  { %1363 = vmatprep.mubr.bf16.mxu1 %v1656_v32 }
 0x313   :  { %1364 = vmatmul.mubr.bf16.gmra.mrb[24].mxu1 %v1658_v33 }
 0x3d6   :  { %v1353_v17 = vpop.f32.mrb[32].mxu0  ;;  %v1357_v0 = vpop.f32.mrb[16].mxu1 }
 0x3d7   :  { %v831_v32 = vmul.f32 %v1726_v15, %v1353_v17  ;;  %v835_v33 = vmul.f32 %v1750_v43, %v1357_v0  ;;  %v766_v9 = vpop.f32.mrb[33].mxu0  ;;  %v782_v35 = vpop.f32.mrb[17].mxu1  ;;  %v2481_v15 = vld [vmem:[#allocation12_spill] sm:$0xff]  ;;  %v2482_v43 = vld [vmem:[#allocation9_spill] sm:$0xff]  ;;  %v855_v0 = vmul.f32 %v2084_v62, %v1896_v34  ;;  %v2486_v62 = vld [vmem:[#allocation18_spill] sm:$0xff] }
 0x3d8   :  { %v829_v6 = vmul.f32 %v1714_v4, %v766_v9  ;;  %v833_v21 = vmul.f32 %v1738_v30, %v782_v35  ;;  %v1354_v37 = vpop.f32.mrb[34].mxu0  ;;  %v1358_v47 = vpop.f32.mrb[18].mxu1  ;;  %v850_v36 = vmul.f32 %v2481_v15, %v2473_v58  ;;  %v2485_v4 = vld [vmem:[#allocation10_spill] sm:$0xff]  ;;  %v856_v9 = vmul.f32 %v2095_v46, %v2476_v39  ;;  %v2487_v35 = vld [vmem:[#allocation13_spill] sm:$0xff] }
 0x3d9   :  { %v832_v60 = vmul.f32 %v2482_v43, %v1354_v37  ;;  %v836_v45 = vmul.f32 %v2483_v13, %v1358_v47  ;;  %v769_v50 = vpop.f32.mrb[35].mxu0  ;;  %v785_v41 = vpop.f32.mrb[19].mxu1  ;;  %v863_v25 = vadd.f32 %v847_v48, %v831_v32  ;;  %v867_v61 = vadd.f32 %v851_v22, %v835_v33 }
 0x3da   :  { %v830_v11 = vmul.f32 %v2484_v1, %v769_v50  ;;  %v834_v53 = vmul.f32 %v2485_v4, %v785_v41  ;;  %v861_v30 = vadd.f32 %v845_v23, %v829_v6  ;;  %v865_v40 = vadd.f32 %v849_v31, %v833_v21 }
 0x3db   :  { %v2177_v8 = vsel %vm896_vm1, %v863_v25, -1e+30  ;;  %880 = vst [vmem:[#allocation4 + $0x110] sm:$0xff] %v863_v25  ;;  %v864_v58 = vadd.f32 %v848_v14, %v832_v60  ;;  %884 = vst [vmem:[#allocation4 + $0x130] sm:$0xff] %v867_v61  ;;  %v868_v19 = vadd.f32 %v852_v42, %v836_v45  ;;  %v2188_v17 = vsel %vm896_vm1, %v867_v61, -1e+30 }
 0x3dc   :  { %919 = vmax.xlane.f32.xlu0 %v2177_v8  ;;  %878 = vst [vmem:[#allocation4 + $0x100] sm:$0xff] %v861_v30  ;;  %v862_v51 = vadd.f32 %v846_v27, %v830_v11  ;;  %882 = vst [vmem:[#allocation4 + $0x120] sm:$0xff] %v865_v40  ;;  %v866_v55 = vadd.f32 %v850_v36, %v834_v53  ;;  %v853_v23 = vmul.f32 %v2089_v2, %v1903_v16 }
 0x3dd   :  { %v2182_v10 = vsel %vm896_vm1, %v864_v58, -1e+30  ;;  %881 = vst [vmem:[#allocation4 + $0x118] sm:$0xff] %v864_v58  ;;  %885 = vst [vmem:[#allocation4 + $0x138] sm:$0xff] %v868_v19  ;;  %v854_v42 = vmul.f32 %v2487_v35, %v2486_v62  ;;  %v903_v6 = vsel %vm896_vm1, %v865_v40, -1e+30  ;;  %v859_v21 = vmul.f32 %v2116_v24, %v1944_v54 }
 0x3de   :  { %v1361_v26 = vpop.f32.mrb[20].mxu1  ;;  %921 = vmax.xlane.f32.xlu1 %v2182_v10  ;;  %879 = vst [vmem:[#allocation4 + $0x108] sm:$0xff] %v862_v51  ;;  %883 = vst [vmem:[#allocation4 + $0x128] sm:$0xff] %v866_v55  ;;  %v2214_v39 = vsel %vm896_vm1, %v862_v51, -1e+30  ;;  %v857_v15 = vmul.f32 %v2121_v7, %v1951_v38  ;;  %v860_v13 = vmul.f32 %v2127_v57, %v1958_v44 }
 0x3df   :  { %v839_v28 = vmul.f32 %v1774_v59, %v1361_v26  ;;  %v798_v48 = vpop.f32.mrb[21].mxu1  ;;  %v2199_v59 = vsel %vm896_vm1, %v868_v19, -1e+30 }
 0x3e0   :  { %v837_v14 = vmul.f32 %v1762_v52, %v798_v48  ;;  %v1362_v22 = vpop.f32.mrb[22].mxu1  ;;  %927 = vmax.xlane.f32.xlu0 %v2188_v17 }
 0x3e1   :  { %v840_v27 = vmul.f32 %v1770_v56, %v1362_v22  ;;  %v801_v32 = vpop.f32.mrb[23].mxu1  ;;  %v871_v33 = vadd.f32 %v855_v0, %v839_v28  ;;  %v2209_v56 = vsel %vm896_vm1, %v861_v30, -1e+30 }
 0x3e2   :  { %v838_v34 = vmul.f32 %v1758_v49, %v801_v32  ;;  %929 = vmax.xlane.f32.xlu1 %v2199_v59  ;;  %v869_v52 = vadd.f32 %v853_v23, %v837_v14 }
 0x3e3   :  { %888 = vst [vmem:[#allocation4 + $0x150] sm:$0xff] %v871_v33  ;;  %v872_v16 = vadd.f32 %v856_v9, %v840_v27  ;;  %v909_v38 = vsel %vm896_vm1, %v871_v33, -1e+30 }
 0x3e4   :  { %915 = vmax.xlane.f32.xlu0 %v2209_v56  ;;  %886 = vst [vmem:[#allocation4 + $0x140] sm:$0xff] %v869_v52  ;;  %v870_v2 = vadd.f32 %v854_v42, %v838_v34 }
 0x3e5   :  { %889 = vst [vmem:[#allocation4 + $0x158] sm:$0xff] %v872_v16  ;;  %v910_v7 = vsel %vm896_vm1, %v872_v16, -1e+30 }
 0x3e6   :  { %v1365_v49 = vpop.f32.mrb[24].mxu1  ;;  %917 = vmax.xlane.f32.xlu1 %v2214_v39  ;;  %887 = vst [vmem:[#allocation4 + $0x148] sm:$0xff] %v870_v2  ;;  %v2241_v44 = vsel %vm896_vm1, %v870_v2, -1e+30 }
 0x3e7   :  { %v843_v46 = vmul.f32 %v1798_v20, %v1365_v49  ;;  %v814_v31 = vpop.f32.mrb[25].mxu1  ;;  %v904_v20 = vsel %vm896_vm1, %v866_v55, -1e+30 }
 0x3e8   :  { %v841_v37 = vmul.f32 %v1786_v5, %v814_v31  ;;  %v1366_v47 = vpop.f32.mrb[26].mxu1  ;;  %923 = vmax.xlane.f32.xlu0 %v903_v6  ;;  %v858_v5 = vmul.f32 %v2130_v18, %v1967_v29 }
 0x3e9   :  { %v844_v36 = vmul.f32 %v1794_v12, %v1366_v47  ;;  %v817_v43 = vpop.f32.mrb[27].mxu1  ;;  %v875_v60 = vadd.f32 %v859_v21, %v843_v46 }
 0x3ea   :  { %v842_v45 = vmul.f32 %v1782_v63, %v817_v43  ;;  %925 = vmax.xlane.f32.xlu1 %v904_v20  ;;  %v873_v54 = vadd.f32 %v857_v15, %v841_v37  ;;  %v907_v63 = vsel %vm896_vm1, %v869_v52, -1e+30 }
 0x3eb   :  { %892 = vst [vmem:[#allocation4 + $0x170] sm:$0xff] %v875_v60  ;;  %v876_v12 = vadd.f32 %v860_v13, %v844_v36  ;;  %v2256_v18 = vsel %vm896_vm1, %v875_v60, -1e+30 }
 0x3ec   :  { %935 = vmax.xlane.f32.xlu0 %v909_v38  ;;  %890 = vst [vmem:[#allocation4 + $0x160] sm:$0xff] %v873_v54  ;;  %v874_v24 = vadd.f32 %v858_v5, %v842_v45  ;;  %v2246_v29 = vsel %vm896_vm1, %v873_v54, -1e+30 }
 0x3ed   :  { %893 = vst [vmem:[#allocation4 + $0x178] sm:$0xff] %v876_v12  ;;  %v2261_v50 = vsel %vm896_vm1, %v876_v12, -1e+30 }
 0x3ee   :  { %937 = vmax.xlane.f32.xlu1 %v910_v7  ;;  %891 = vst [vmem:[#allocation4 + $0x168] sm:$0xff] %v874_v24  ;;  %v2251_v57 = vsel %vm896_vm1, %v874_v24, -1e+30 }
 0x3f0   :  { %931 = vmax.xlane.f32.xlu0 %v907_v63 }
 0x3f2   :  { %933 = vmax.xlane.f32.xlu1 %v2241_v44 }
 0x3f4   :  { %939 = vmax.xlane.f32.xlu0 %v2246_v29 }
 0x3f6   :  { %941 = vmax.xlane.f32.xlu1 %v2251_v57 }
 0x3f8   :  { %943 = vmax.xlane.f32.xlu0 %v2256_v18 }
 0x3fa   :  { %945 = vmax.xlane.f32.xlu1 %v2261_v50 }
 0x469   :  { %v920_v41 = vpop.xlane.xlu0 %919 }
 0x46a   :  { %v2265_v25 = vsub.f32 %v2177_v8, %v920_v41 }
 0x46b   :  { %v922_v61 = vpop.xlane.xlu1 %921 }
 0x46c   :  { %v967_v1 = vmul.f32 1.442695, %v2265_v25  ;;  %v2269_v11 = vsub.f32 %v2182_v10, %v922_v61 }
 0x46d   :  { %v928_v4 = vpop.xlane.xlu0 %927 }
 0x46e   :  { %1427 = vpow2.f32 %v967_v1  ;;  %v969_v53 = vmul.f32 1.442695, %v2269_v11  ;;  %v2273_v30 = vsub.f32 %v2188_v17, %v928_v4 }
 0x46f   :  { %v930_v40 = vpop.xlane.xlu1 %929 }
 0x470   :  { %1429 = vpow2.f32 %v969_v53  ;;  %v975_v58 = vmul.f32 1.442695, %v2273_v30  ;;  %v2277_v8 = vsub.f32 %v2199_v59, %v930_v40 }
 0x471   :  { %v916_v19 = vpop.xlane.xlu0 %915 }
 0x472   :  { %1431 = vpow2.f32 %v975_v58  ;;  %v977_v51 = vmul.f32 1.442695, %v2277_v8  ;;  %v2281_v55 = vsub.f32 %v2209_v56, %v916_v19 }
 0x473   :  { %v918_v10 = vpop.xlane.xlu1 %917 }
 0x474   :  { %1433 = vpow2.f32 %v977_v51  ;;  %v963_v26 = vmul.f32 1.442695, %v2281_v55  ;;  %v2285_v28 = vsub.f32 %v2214_v39, %v918_v10 }
 0x475   :  { %v924_v48 = vpop.xlane.xlu0 %923 }
 0x476   :  { %1435 = vpow2.f32 %v963_v26  ;;  %v965_v17 = vmul.f32 1.442695, %v2285_v28  ;;  %v2288_v0 = vsub.f32 %v903_v6, %v924_v48 }
 0x477   :  { %v926_v14 = vpop.xlane.xlu1 %925 }
 0x478   :  { %v1428_v22 = vpop.eup %1427  ;;  %1437 = vpow2.f32 %v965_v17  ;;  %v971_v23 = vmul.f32 1.442695, %v2288_v0  ;;  %v2291_v27 = vsub.f32 %v904_v20, %v926_v14 }
 0x479   :  { %v936_v32 = vpop.xlane.xlu0 %935  ;;  %v997_v59 = vsel %vm896_vm1, %v1428_v22, 0.0 }
 0x47a   :  { %v1430_v33 = vpop.eup %1429  ;;  %1439 = vpow2.f32 %v971_v23  ;;  %v973_v9 = vmul.f32 1.442695, %v2291_v27  ;;  %v2296_v34 = vsub.f32 %v909_v38, %v936_v32  ;;  %1015 = vadd.xlane.f32.xlu0 %v997_v59 }
 0x47b   :  { %v938_v52 = vpop.xlane.xlu1 %937  ;;  %v998_v62 = vsel %vm896_vm1, %v1430_v33, 0.0 }
 0x47c   :  { %v1432_v35 = vpop.eup %1431  ;;  %1441 = vpow2.f32 %v973_v9  ;;  %v983_v42 = vmul.f32 1.442695, %v2296_v34  ;;  %v2301_v56 = vsub.f32 %v910_v7, %v938_v52  ;;  %1017 = vadd.xlane.f32.xlu1 %v998_v62 }
 0x47d   :  { %v932_v16 = vpop.xlane.xlu0 %931  ;;  %v1001_v2 = vsel %vm896_vm1, %v1432_v35, 0.0 }
 0x47e   :  { %v1434_v39 = vpop.eup %1433  ;;  %1443 = vpow2.f32 %v983_v42  ;;  %v985_v49 = vmul.f32 1.442695, %v2301_v56  ;;  %v2306_v46 = vsub.f32 %v907_v63, %v932_v16  ;;  %1023 = vadd.xlane.f32.xlu0 %v1001_v2 }
 0x47f   :  { %v934_v31 = vpop.xlane.xlu1 %933  ;;  %v1002_v6 = vsel %vm896_vm1, %v1434_v39, 0.0 }
 0x480   :  { %v1436_v21 = vpop.eup %1435  ;;  %1445 = vpow2.f32 %v985_v49  ;;  %v979_v37 = vmul.f32 1.442695, %v2306_v46  ;;  %v2312_v47 = vsub.f32 %v2241_v44, %v934_v31  ;;  %1025 = vadd.xlane.f32.xlu1 %v1002_v6 }
 0x481   :  { %v940_v15 = vpop.xlane.xlu0 %939  ;;  %v995_v36 = vsel %vm896_vm1, %v1436_v21, 0.0 }
 0x482   :  { %v1438_v43 = vpop.eup %1437  ;;  %1447 = vpow2.f32 %v979_v37  ;;  %v981_v20 = vmul.f32 1.442695, %v2312_v47  ;;  %v2318_v60 = vsub.f32 %v2246_v29, %v940_v15  ;;  %1011 = vadd.xlane.f32.xlu0 %v995_v36 }
 0x483   :  { %v942_v13 = vpop.xlane.xlu1 %941  ;;  %v996_v45 = vsel %vm896_vm1, %v1438_v43, 0.0 }
 0x484   :  { %v1440_v54 = vpop.eup %1439  ;;  %1449 = vpow2.f32 %v981_v20  ;;  %v987_v5 = vmul.f32 1.442695, %v2318_v60  ;;  %v2324_v38 = vsub.f32 %v2251_v57, %v942_v13  ;;  %1013 = vadd.xlane.f32.xlu1 %v996_v45 }
 0x485   :  { %v944_v12 = vpop.xlane.xlu0 %943  ;;  %v999_v24 = vsel %vm896_vm1, %v1440_v54, 0.0 }
 0x486   :  { %v1442_v7 = vpop.eup %1441  ;;  %1451 = vpow2.f32 %v987_v5  ;;  %v989_v63 = vmul.f32 1.442695, %v2324_v38  ;;  %v2330_v44 = vsub.f32 %v2256_v18, %v944_v12  ;;  %1019 = vadd.xlane.f32.xlu0 %v999_v24 }
 0x487   :  { %v946_v29 = vpop.xlane.xlu1 %945  ;;  %v1000_v41 = vsel %vm896_vm1, %v1442_v7, 0.0 }
 0x488   :  { %v1444_v61 = vpop.eup %1443  ;;  %1453 = vpow2.f32 %v989_v63  ;;  %v991_v57 = vmul.f32 1.442695, %v2330_v44  ;;  %v2336_v1 = vsub.f32 %v2261_v50, %v946_v29  ;;  %1021 = vadd.xlane.f32.xlu1 %v1000_v41 }
 0x489   :  { %v1005_v4 = vsel %vm896_vm1, %v1444_v61, 0.0 }
 0x48a   :  { %v1446_v53 = vpop.eup %1445  ;;  %1455 = vpow2.f32 %v991_v57  ;;  %v993_v18 = vmul.f32 1.442695, %v2336_v1  ;;  %1031 = vadd.xlane.f32.xlu0 %v1005_v4 }
 0x48b   :  { %v1006_v40 = vsel %vm896_vm1, %v1446_v53, 0.0 }
 0x48c   :  { %v1448_v58 = vpop.eup %1447  ;;  %1457 = vpow2.f32 %v993_v18  ;;  %1033 = vadd.xlane.f32.xlu1 %v1006_v40 }
 0x48d   :  { %v1003_v19 = vsel %vm896_vm1, %v1448_v58, 0.0 }
 0x48e   :  { %v1450_v50 = vpop.eup %1449  ;;  %1027 = vadd.xlane.f32.xlu0 %v1003_v19 }
 0x48f   :  { %v1004_v51 = vsel %vm896_vm1, %v1450_v50, 0.0 }
 0x490   :  { %v1452_v10 = vpop.eup %1451  ;;  %1029 = vadd.xlane.f32.xlu1 %v1004_v51 }
 0x491   :  { %v1007_v26 = vsel %vm896_vm1, %v1452_v10, 0.0 }
 0x492   :  { %v1454_v48 = vpop.eup %1453  ;;  %1035 = vadd.xlane.f32.xlu0 %v1007_v26 }
 0x493   :  { %v1008_v17 = vsel %vm896_vm1, %v1454_v48, 0.0 }
 0x494   :  { %v1456_v14 = vpop.eup %1455  ;;  %1037 = vadd.xlane.f32.xlu1 %v1008_v17 }
 0x495   :  { %v1009_v22 = vsel %vm896_vm1, %v1456_v14, 0.0 }
 0x496   :  { %v1458_v23 = vpop.eup %1457  ;;  %1039 = vadd.xlane.f32.xlu0 %v1009_v22 }
 0x497   :  { %v1010_v32 = vsel %vm896_vm1, %v1458_v23, 0.0 }
 0x498   :  { %1041 = vadd.xlane.f32.xlu1 %v1010_v32 }
 0x499   :  { %1502 = shalt.err (!%p1499_p4)
}
 0x49a   :  { %s1503_s9 = scalar_lea.hbm %s2437_s4, 6144 }
 0x49b   :  { %p1504_p5 = scmp.ne.s32.totalorder %s2437_s4, %s1503_s9  ;;  %p1507_p6 = scmp.lt.u32.totalorder %s1503_s9, %s2437_s4 }
 0x49d   :  { %p1509_p7 = pnand %p1507_p6, %p1504_p5 }
 0x49f   :  { %1512 = shalt.err (!%p1509_p7)
}
 0x4a0   :  { %s1540_s13 = smov 128   ;;  %s1541_s14 = smov 8  }
 0x4a1   :  { %1146 = dma.vmem_to_hbm [thread:$0]  %s1141_s5, 6144, %s2437_s4, [#allocation5], %s1540_s13, %s1540_s13, %s1541_s14  }
 0x4a2   :  { %s1542_s4 = smov [#allocation2]  }
 0x4a3   :  { %s1128_s17 = sshll.u32 %s1542_s4, 4  ;;  %s1129_s17 = int_to_ptr.vmem [resolvable:$true] %s1128_s17 }
 0x4a4   :  { %s1513_s18 = scalar_lea.vmem %s1129_s17, 2048  ;;  %p1518_p9 = scmp.lt.s32.totalorder %s1129_s17, %s1129_s17 }
 0x4a5   :  { %p1514_p8 = scmp.ne.s32.totalorder %s1129_s17, %s1513_s18  ;;  %p1519_p10 = scmp.lt.s32.totalorder %s1513_s18, %s1513_s18 }
 0x4a7   :  { %p1520_p11 = por %p1519_p10, %p1518_p9 }
 0x4a9   :  { %p1521_p12 = pnand %p1520_p11, %p1514_p8 }
 0x507   :  { %v1016_v59 = vpop.xlane.xlu0 %1015 }
 0x508   :  { %1459 = vlog2.f32 %v1016_v59 }
 0x509   :  { %v1018_v33 = vpop.xlane.xlu1 %1017 }
 0x50a   :  { %1461 = vlog2.f32 %v1018_v33 }
 0x50b   :  { %v1024_v9 = vpop.xlane.xlu0 %1023 }
 0x50c   :  { %1463 = vlog2.f32 %v1024_v9 }
 0x50d   :  { %v1026_v52 = vpop.xlane.xlu1 %1025 }
 0x50e   :  { %1465 = vlog2.f32 %v1026_v52 }
 0x50f   :  { %v1012_v62 = vpop.xlane.xlu0 %1011 }
 0x510   :  { %1467 = vlog2.f32 %v1012_v62 }
 0x511   :  { %v1014_v35 = vpop.xlane.xlu1 %1013 }
 0x512   :  { %v1460_v42 = vpop.eup %1459  ;;  %1469 = vlog2.f32 %v1014_v35 }
 0x513   :  { %v1048_v16 = vmul.f32 0.6931472, %v1460_v42  ;;  %v1020_v2 = vpop.xlane.xlu0 %1019 }
 0x514   :  { %v1462_v39 = vpop.eup %1461  ;;  %1471 = vlog2.f32 %v1020_v2 }
 0x515   :  { %v1077_v49 = vsub.f32 %v2265_v25, %v1048_v16  ;;  %v1050_v31 = vmul.f32 0.6931472, %v1462_v39  ;;  %v1022_v6 = vpop.xlane.xlu1 %1021 }
 0x516   :  { %v1464_v21 = vpop.eup %1463  ;;  %1473 = vlog2.f32 %v1022_v6 }
 0x517   :  { %v1093_v37 = vsel %vm896_vm1, %v1077_v49, 0.0  ;;  %v1078_v15 = vsub.f32 %v2269_v11, %v1050_v31  ;;  %v1056_v36 = vmul.f32 0.6931472, %v1464_v21  ;;  %v1032_v43 = vpop.xlane.xlu0 %1031 }
 0x518   :  { %v1466_v20 = vpop.eup %1465  ;;  %1109 = vst [vmem:[#allocation2 + $0x10] sm:$0xff] %v1093_v37  ;;  %1475 = vlog2.f32 %v1032_v43 }
 0x519   :  { %v1094_v13 = vsel %vm896_vm1, %v1078_v15, 0.0  ;;  %v1081_v45 = vsub.f32 %v2273_v30, %v1056_v36  ;;  %v1058_v25 = vmul.f32 0.6931472, %v1466_v20  ;;  %v1034_v54 = vpop.xlane.xlu1 %1033 }
 0x51a   :  { %v1468_v5 = vpop.eup %1467  ;;  %1110 = vst [vmem:[#allocation2 + $0x18] sm:$0xff] %v1094_v13  ;;  %1477 = vlog2.f32 %v1034_v54 }
 0x51b   :  { %v1097_v12 = vsel %vm896_vm1, %v1081_v45, 0.0  ;;  %v1082_v11 = vsub.f32 %v2277_v8, %v1058_v25  ;;  %v1044_v24 = vmul.f32 0.6931472, %v1468_v5  ;;  %v1028_v7 = vpop.xlane.xlu0 %1027 }
 0x51c   :  { %v1470_v63 = vpop.eup %1469  ;;  %1113 = vst [vmem:[#allocation2 + $0x30] sm:$0xff] %v1097_v12  ;;  %1479 = vlog2.f32 %v1028_v7 }
 0x51d   :  { %v1098_v29 = vsel %vm896_vm1, %v1082_v11, 0.0  ;;  %v1075_v30 = vsub.f32 %v2281_v55, %v1044_v24  ;;  %v1046_v41 = vmul.f32 0.6931472, %v1470_v63  ;;  %v1030_v61 = vpop.xlane.xlu1 %1029 }
 0x51e   :  { %v1472_v57 = vpop.eup %1471  ;;  %1114 = vst [vmem:[#allocation2 + $0x38] sm:$0xff] %v1098_v29  ;;  %1481 = vlog2.f32 %v1030_v61 }
 0x51f   :  { %v1091_v4 = vsel %vm896_vm1, %v1075_v30, 0.0  ;;  %v1076_v8 = vsub.f32 %v2285_v28, %v1046_v41  ;;  %v1052_v53 = vmul.f32 0.6931472, %v1472_v57  ;;  %v1036_v18 = vpop.xlane.xlu0 %1035 }
 0x520   :  { %v1474_v40 = vpop.eup %1473  ;;  %1107 = vst [vmem:[#allocation2] sm:$0xff] %v1091_v4  ;;  %1483 = vlog2.f32 %v1036_v18 }
 0x521   :  { %v1092_v58 = vsel %vm896_vm1, %v1076_v8, 0.0  ;;  %v1079_v55 = vsub.f32 %v2288_v0, %v1052_v53  ;;  %v1054_v19 = vmul.f32 0.6931472, %v1474_v40  ;;  %v1038_v50 = vpop.xlane.xlu1 %1037 }
 0x522   :  { %v1476_v51 = vpop.eup %1475  ;;  %1108 = vst [vmem:[#allocation2 + $0x8] sm:$0xff] %v1092_v58  ;;  %1485 = vlog2.f32 %v1038_v50 }
 0x523   :  { %v1095_v10 = vsel %vm896_vm1, %v1079_v55, 0.0  ;;  %v1080_v28 = vsub.f32 %v2291_v27, %v1054_v19  ;;  %v1064_v26 = vmul.f32 0.6931472, %v1476_v51  ;;  %v1040_v48 = vpop.xlane.xlu0 %1039 }
 0x524   :  { %v1478_v17 = vpop.eup %1477  ;;  %1111 = vst [vmem:[#allocation2 + $0x20] sm:$0xff] %v1095_v10  ;;  %1487 = vlog2.f32 %v1040_v48 }
 0x525   :  { %v1096_v14 = vsel %vm896_vm1, %v1080_v28, 0.0  ;;  %v1085_v0 = vsub.f32 %v2296_v34, %v1064_v26  ;;  %v1066_v22 = vmul.f32 0.6931472, %v1478_v17  ;;  %v1042_v23 = vpop.xlane.xlu1 %1041 }
 0x526   :  { %v1480_v32 = vpop.eup %1479  ;;  %1112 = vst [vmem:[#allocation2 + $0x28] sm:$0xff] %v1096_v14  ;;  %1489 = vlog2.f32 %v1042_v23 }
 0x527   :  { %v1101_v59 = vsel %vm896_vm1, %v1085_v0, 0.0  ;;  %v1086_v27 = vsub.f32 %v2301_v56, %v1066_v22  ;;  %v1060_v33 = vmul.f32 0.6931472, %v1480_v32 }
 0x528   :  { %v1482_v9 = vpop.eup %1481  ;;  %1117 = vst [vmem:[#allocation2 + $0x50] sm:$0xff] %v1101_v59 }
 0x529   :  { %v1102_v52 = vsel %vm896_vm1, %v1086_v27, 0.0  ;;  %v1083_v62 = vsub.f32 %v2306_v46, %v1060_v33  ;;  %v1062_v35 = vmul.f32 0.6931472, %v1482_v9 }
 0x52a   :  { %v1484_v34 = vpop.eup %1483  ;;  %1118 = vst [vmem:[#allocation2 + $0x58] sm:$0xff] %v1102_v52 }
 0x52b   :  { %v1099_v42 = vsel %vm896_vm1, %v1083_v62, 0.0  ;;  %v1084_v16 = vsub.f32 %v2312_v47, %v1062_v35  ;;  %v1068_v2 = vmul.f32 0.6931472, %v1484_v34 }
 0x52c   :  { %v1486_v39 = vpop.eup %1485  ;;  %1115 = vst [vmem:[#allocation2 + $0x40] sm:$0xff] %v1099_v42 }
 0x52d   :  { %v1100_v56 = vsel %vm896_vm1, %v1084_v16, 0.0  ;;  %v1087_v49 = vsub.f32 %v2318_v60, %v1068_v2  ;;  %v1070_v31 = vmul.f32 0.6931472, %v1486_v39 }
 0x52e   :  { %v1488_v6 = vpop.eup %1487  ;;  %1116 = vst [vmem:[#allocation2 + $0x48] sm:$0xff] %v1100_v56 }
 0x52f   :  { %v1103_v46 = vsel %vm896_vm1, %v1087_v49, 0.0  ;;  %v1088_v21 = vsub.f32 %v2324_v38, %v1070_v31  ;;  %v1072_v37 = vmul.f32 0.6931472, %v1488_v6 }
 0x530   :  { %v1490_v15 = vpop.eup %1489  ;;  %1119 = vst [vmem:[#allocation2 + $0x60] sm:$0xff] %v1103_v46 }
 0x531   :  { %v1104_v47 = vsel %vm896_vm1, %v1088_v21, 0.0  ;;  %v1089_v36 = vsub.f32 %v2330_v44, %v1072_v37  ;;  %v1074_v43 = vmul.f32 0.6931472, %v1490_v15 }
 0x532   :  { %1120 = vst [vmem:[#allocation2 + $0x68] sm:$0xff] %v1104_v47 }
 0x533   :  { %v1105_v60 = vsel %vm896_vm1, %v1089_v36, 0.0  ;;  %v1090_v20 = vsub.f32 %v2336_v1, %v1074_v43 }
 0x534   :  { %1121 = vst [vmem:[#allocation2 + $0x70] sm:$0xff] %v1105_v60 }
 0x535   :  { %v1106_v38 = vsel %vm896_vm1, %v1090_v20, 0.0 }
 0x536   :  { %1122 = vst [vmem:[#allocation2 + $0x78] sm:$0xff] %v1106_v38 }
 0x537   :  { %1524 = shalt.err (!%p1521_p12)
}
 0x538   :  { %s1525_s21 = scalar_lea.hbm %s2436_s3, 2048 }
 0x539   :  { %p1526_p13 = scmp.ne.s32.totalorder %s2436_s3, %s1525_s21  ;;  %p1529_p0 = scmp.lt.u32.totalorder %s1525_s21, %s2436_s3 }
 0x53b   :  { %p1531_p1 = pnand %p1529_p0, %p1526_p13 }
 0x53d   :  { %1534 = shalt.err (!%p1531_p1)
}
 0x53e   :  { %1134 = dma.vmem_to_hbm [thread:$0]  %s1129_s17, 2048, %s2436_s3, [#allocation3], %s1540_s13, %s1540_s13, %s1541_s14  }
 0x53f   :  { %1535 = dma.done.wait [#allocation3], 2048  }
 0x540   :  { %1536 = vsyncadd [#allocation3], 4294965248 }
 0x541   :  { %1537 = dma.done.wait [#allocation5], 6144  }
 0x542   :  { %1538 = vsyncadd [#allocation5], 4294961152 }
 0x543   :  { %1153 = vsyncpa [#allocation3], 1 }
 0x544   :  { %1154 = vsyncpa [#allocation5], 1 }

</bundles_post_ra>
